<compile_context>
chip_gen: v7x
topology: tpu7x:2x2x1
jax: 0.10.0
libtpu: 0.0.40
codegen_flags: <defaults>
</compile_context>

<pallas_src>
import functools
import math

import jax
import jax.numpy as jnp
from jax.experimental import pallas as pl
from jax.experimental.pallas import tpu as pltpu


def _mbn_kernel(x_ref, scale_ref, offset_ref, o_ref):
    # Pure VPU hot path: y = x * scale + offset.  scale/offset blocks are
    # either (TR, 1) (lane-broadcast) or (1, TC) (sublane-broadcast); both
    # broadcast against the (TR, TC) x tile.  f32 math, native-dtype IO.
    x = x_ref[...].astype(jnp.float32)
    y = x * scale_ref[...] + offset_ref[...]
    o_ref[...] = y.astype(o_ref.dtype)


def _gen_budgets():
    """Per-generation (x_tile_target_bytes, vmem_budget_bytes, vmem_limit_bytes)."""
    kind = ""
    try:
        kind = jax.devices()[0].device_kind.lower()
    except Exception:  # pragma: no cover - defensive
        pass
    if "v7" in kind or "tpu7" in kind:
        # 64 MiB physical VMEM, 3.2 TB/s HBM: bigger tiles, but stay well clear
        # of the physical limit.
        return 5 << 20, 40 << 20, 48 << 20
    if "v6" in kind or "trillium" in kind:
        return 4 << 20, 26 << 20, 36 << 20
    if "v5e" in kind or "v5 lite" in kind or "v5lite" in kind:
        # 16 MiB default scoped VMEM, ~0.8 TB/s HBM: 2 MiB tiles already hide
        # the per-step overhead; don't chase larger tiles here.
        return 2 << 20, 12 << 20, 20 << 20
    # Unknown / older chips: conservative sizes, leave the scoped limit alone.
    return 2 << 20, 12 << 20, None


def _pick_tiles(rows, lanes, itemsize, plane_rows, x_tile_target, vmem_budget):
    """Pick (TR, TC) respecting (8,128) legality and the total VMEM budget.

    Budget model (double-buffered x + out, plus padded f32 param blocks):
      plane rows:  4*tr*tc*itemsize + 2048*tr   <= vmem_budget
      sample rows: 4*tr*tc*itemsize +  256*tc   <= vmem_budget
    """
    # ---- lane (last-dim) tile: full extent if affordable, else 128-multiples.
    tc_cap = max(128, (x_tile_target // (8 * itemsize)) // 128 * 128)
    if not plane_rows:
        # Also keep the (1, tc) param blocks (padded to 8 sublanes, x2 params,
        # x2 buffers) plus an 8-row x/out tile inside the budget.
        tc_cap = min(tc_cap,
                     max(128, (vmem_budget // (32 * itemsize + 256)) // 128 * 128))
    tc = lanes if lanes <= tc_cap else tc_cap

    # ---- row (sublane) tile: hit the per-tile target and the VMEM budget.
    tile_rows = max(8, (x_tile_target // max(1, tc * itemsize)) // 8 * 8)
    if plane_rows:
        vmem_rows = vmem_budget // (4 * tc * itemsize + 2048)
    else:
        vmem_rows = max(8, vmem_budget - 256 * tc) // (4 * tc * itemsize)
    tr_max = max(8, min(tile_rows, vmem_rows) // 8 * 8)
    tr = rows if rows <= tr_max else tr_max

    # ---- never collapse to a single grid step on a non-tiny slab: keep >= 2
    # tiles so megacore (v7x) can shard and the DMA pipeline overlaps.
    if (pl.cdiv(rows, tr) * pl.cdiv(lanes, tc) == 1
            and rows * lanes * itemsize > (1 << 20)):
        if rows >= 16:
            tr = (-(-rows // 2) + 7) // 8 * 8
        elif lanes >= 256:
            tc = (-(-lanes // 2) + 127) // 128 * 128
    return tr, tc


@functools.partial(jax.jit, static_argnames=("epsilon",))
def marker_based_norm(x, mean, std, weight, bias, epsilon=0.1):
    """JAX/Pallas equivalent of _MarkerBasedNorm.forward for NC... input."""
    out_dtype = x.dtype
    N, C = x.shape[0], x.shape[1]
    hw = int(math.prod(x.shape[2:]))  # == 1 if there are no spatial dims
    itemsize = jnp.dtype(out_dtype).itemsize

    # Parameter glue (plain JAX, f32): fold mean/std/weight/bias.
    eps = jnp.float32(epsilon)
    scale = weight.astype(jnp.float32) / (std.astype(jnp.float32) + eps)   # (C,)
    offset = bias.astype(jnp.float32) - mean.astype(jnp.float32) * scale    # (C,)

    x_tile_target, vmem_budget, vmem_limit = _gen_budgets()

    plane_rows = hw >= 128
    if plane_rows:
        # (N*C, hw): one (sample, channel) plane per row; per-row param column.
        rows, lanes = N * C, hw
        x2 = x.reshape(rows, lanes)
        scale2 = jnp.broadcast_to(scale[None, :], (N, C)).reshape(rows, 1)
        offset2 = jnp.broadcast_to(offset[None, :], (N, C)).reshape(rows, 1)
    else:
        # (N, C*hw): channels land on lanes (lane-dense even for hw == 1);
        # per-lane param row with each channel value repeated hw times.
        rows, lanes = N, C * hw
        x2 = x.reshape(rows, lanes)
        scale2 = jnp.repeat(scale, hw)[None, :]
        offset2 = jnp.repeat(offset, hw)[None, :]

    tr, tc = _pick_tiles(rows, lanes, itemsize, plane_rows,
                         x_tile_target, vmem_budget)
    gr, gc = pl.cdiv(rows, tr), pl.cdiv(lanes, tc)

    if plane_rows:
        # rows outer, lanes inner: the (tr, 1) param index (i, 0) is constant
        # across the inner axis, so Pallas does not re-DMA it per step.
        grid = (gr, gc)
        x_spec = pl.BlockSpec((tr, tc), lambda i, j: (i, j))
        p_spec = pl.BlockSpec((tr, 1), lambda i, j: (i, 0))
        o_spec = pl.BlockSpec((tr, tc), lambda i, j: (i, j))
        param_bytes = 2 * rows * 4
    else:
        # lanes outer, rows inner: the (1, tc) param index (0, j) is constant
        # across the inner axis.
        grid = (gc, gr)
        x_spec = pl.BlockSpec((tr, tc), lambda j, i: (i, j))
        p_spec = pl.BlockSpec((1, tc), lambda j, i: (0, j))
        o_spec = pl.BlockSpec((tr, tc), lambda j, i: (i, j))
        param_bytes = 2 * lanes * 4

    cost = pl.CostEstimate(
        flops=2 * rows * lanes,
        transcendentals=0,
        bytes_accessed=2 * rows * lanes * itemsize + param_bytes,
    )

    cp_kwargs = dict(dimension_semantics=("parallel", "parallel"))
    if vmem_limit is not None:
        cp_kwargs["vmem_limit_bytes"] = int(vmem_limit)

    out2 = pl.pallas_call(
        _mbn_kernel,
        out_shape=jax.ShapeDtypeStruct((rows, lanes), out_dtype),
        grid=grid,
        in_specs=[x_spec, p_spec, p_spec],
        out_specs=o_spec,
        compiler_params=pltpu.CompilerParams(**cp_kwargs),
        cost_estimate=cost,
    )(x2, scale2, offset2)

    return out2.reshape(x.shape)


def _reference(x, mean, std, weight, bias, epsilon=0.1):
    # Pure-JAX reference mirroring the PyTorch forward exactly.
    n_dims = x.ndim - 2
    shape = (-1,) + (1,) * n_dims
    xn = (x - mean.reshape(shape)) / (std + epsilon).reshape(shape)
    return xn * weight.reshape(shape) + bias.reshape(shape)


if __name__ == "__main__":
    key = jax.random.PRNGKey(0)
    k_x, k_mean, k_std, k_x2 = jax.random.split(key, 4)

    # Case 1: NCHW input with hw % 128 == 0 -> plane-rows layout.
    N, C, H, W = 2, 4, 16, 16
    x = jax.random.normal(k_x, (N, C, H, W), dtype=jnp.float32)

    # Deterministic parameters consistent with the module's __init__:
    #   weight = ones(C), bias = zeros(C); mean/std buffers given some values.
    mean = jax.random.normal(k_mean, (C,), dtype=jnp.float32)
    std = jax.random.uniform(k_std, (C,), jnp.float32, minval=0.5, maxval=1.5)
    weight = jnp.ones((C,), dtype=jnp.float32)
    bias = jnp.zeros((C,), dtype=jnp.float32)

    y = jax.block_until_ready(marker_based_norm(x, mean, std, weight, bias, epsilon=0.1))
    y_ref = _reference(x, mean, std, weight, bias, epsilon=0.1)
    assert y.shape == x.shape and y.dtype == x.dtype
    assert jnp.allclose(y, y_ref, atol=1e-5, rtol=1e-5), "mismatch vs reference (NCHW)"

    # Case 2: pure NC tensor (no spatial dims) -> channels-on-lanes layout.
    N2, C2 = 2, 32
    x_nc = jax.random.normal(k_x2, (N2, C2), dtype=jnp.float32)
    mean2 = jnp.linspace(-1.0, 1.0, C2, dtype=jnp.float32)
    std2 = jnp.linspace(0.5, 1.5, C2, dtype=jnp.float32)
    w2 = jnp.full((C2,), 1.25, dtype=jnp.float32)
    b2 = jnp.full((C2,), -0.5, dtype=jnp.float32)

    y2 = jax.block_until_ready(marker_based_norm(x_nc, mean2, std2, w2, b2, epsilon=0.1))
    y2_ref = _reference(x_nc, mean2, std2, w2, b2, epsilon=0.1)
    assert y2.shape == x_nc.shape and y2.dtype == x_nc.dtype
    assert jnp.allclose(y2, y2_ref, atol=1e-5, rtol=1e-5), "mismatch vs reference (NC)"

    print("KERNEL_OK")
</pallas_src>

<mosaic_0001>
module attributes {stable_mosaic.version = 11 : i64} {
  func.func @_mbn_kernel(%arg0: i32, %arg1: i32, %arg2: memref<8x256xf32, #tpu.memory_space<vmem>>, %arg3: memref<8x1xf32, #tpu.memory_space<vmem>>, %arg4: memref<8x1xf32, #tpu.memory_space<vmem>>, %arg5: memref<8x256xf32, #tpu.memory_space<vmem>>) attributes {dimension_semantics = [#tpu.dimension_semantics<parallel>, #tpu.dimension_semantics<parallel>], iteration_bounds = array<i64: 1, 1>, scalar_prefetch = 0 : i64, scratch_operands = 0 : i64, tpu.core_type = #tpu.core_type<tc>, window_params = [{transform_indices = @transform_0, window_bounds = array<i64: 8, 256>}, {transform_indices = @transform_1, window_bounds = array<i64: 8, 1>}, {transform_indices = @transform_2, window_bounds = array<i64: 8, 1>}, {transform_indices = @transform_3, window_bounds = array<i64: 8, 256>}]} {
    %c0 = arith.constant 0 : index
    %c0_0 = arith.constant 0 : index
    %0 = vector.load %arg2[%c0, %c0_0] : memref<8x256xf32, #tpu.memory_space<vmem>>, vector<8x256xf32>
    %c0_1 = arith.constant 0 : index
    %c0_2 = arith.constant 0 : index
    %1 = vector.load %arg3[%c0_1, %c0_2] : memref<8x1xf32, #tpu.memory_space<vmem>>, vector<8x1xf32>
    %2 = vector.broadcast %1 : vector<8x1xf32> to vector<8x256xf32>
    %3 = arith.mulf %0, %2 : vector<8x256xf32>
    %c0_3 = arith.constant 0 : index
    %c0_4 = arith.constant 0 : index
    %4 = vector.load %arg4[%c0_3, %c0_4] : memref<8x1xf32, #tpu.memory_space<vmem>>, vector<8x1xf32>
    %5 = vector.broadcast %4 : vector<8x1xf32> to vector<8x256xf32>
    %6 = arith.addf %3, %5 : vector<8x256xf32>
    %c0_5 = arith.constant 0 : index
    %c0_6 = arith.constant 0 : index
    %7 = vector.load %arg5[%c0_5, %c0_6] : memref<8x256xf32, #tpu.memory_space<vmem>>, vector<8x256xf32>
    tpu.vector_store %arg5[%c0_5, %c0_6], %6 {strides = array<i32>} : memref<8x256xf32, #tpu.memory_space<vmem>>, vector<8x256xf32>,
    return
  }
  func.func @transform_0(%arg0: i32, %arg1: i32) -> (i32, i32) {
    %c0_i32 = arith.constant 0 : i32
    return %arg0, %arg1 : i32, i32
  }
  func.func @transform_1(%arg0: i32, %arg1: i32) -> (i32, i32) {
    %c0_i32 = arith.constant 0 : i32
    %c0_i32_0 = arith.constant 0 : i32
    return %arg0, %c0_i32 : i32, i32
  }
  func.func @transform_2(%arg0: i32, %arg1: i32) -> (i32, i32) {
    %c0_i32 = arith.constant 0 : i32
    %c0_i32_0 = arith.constant 0 : i32
    return %arg0, %c0_i32 : i32, i32
  }
  func.func @transform_3(%arg0: i32, %arg1: i32) -> (i32, i32) {
    %c0_i32 = arith.constant 0 : i32
    return %arg0, %arg1 : i32, i32
  }
}

</mosaic_0001>

<bundles_post_ra>
// kernel: marker_based_norm.1
= control target key start
LH: loop header
LB: loop body
LE: loop exit
PB: predicated region body
PF: predicated region fallthrough
CT: control target
= control target key end

     0   :  { %v40_v0 = vmov 0   ;;  %s79_s1 = inlined_call_operand.vmem [shape: f32[8,1], index: 1, kind: input, shape index: {}]   ;;  %s80_s2 = inlined_call_operand.vmem [shape: f32[8,1], index: 2, kind: input, shape index: {}]   ;;  %s81_s0 = inlined_call_operand.vmem [shape: f32[8,256], index: 0, kind: input, shape index: {}]   ;;  %s82_s3 = inlined_call_operand.vmem [shape: f32[8,256], index: 3, kind: output, shape index: {}]  }
   0x1   :  { %39 = vset.pattern.permute.xlu0 %v40_v0  ;;  %v16_v1 = vld [vmem:[%s79_s1] sm:$0xff]  ;;  %v15_v5 = vld [vmem:[%s81_s0 + $0x8] sm:$0xff] }
   0x2   :  { %19 = vperm.xlu0 %39, %v16_v1   ;;  %v24_v2 = vld [vmem:[%s80_s2] sm:$0xff] }
   0x3   :  { %v14_v4 = vld [vmem:[%s81_s0] sm:$0xff] }
   0x6   :  { %27 = vperm.xlu0 %39, %v24_v2  }
  0x81   :  { %v20_v3 = vpop.permute.xlu0 %19 }
  0x82   :  { %v22_v6 = vmul.f32 %v20_v3, %v14_v4  ;;  %v23_v7 = vmul.f32 %v20_v3, %v15_v5 }
  0x85   :  { %v28_v8 = vpop.permute.xlu0 %27 }
  0x86   :  { %v30_v9 = vadd.f32 %v28_v8, %v22_v6  ;;  %v31_v10 = vadd.f32 %v28_v8, %v23_v7 }
  0x88   :  { %32 = vst [vmem:[%s82_s3] sm:$0xff] %v30_v9  ;;  %33 = vst [vmem:[%s82_s3 + $0x8] sm:$0xff] %v31_v10 }

</bundles_post_ra>
